<compile_context>
chip_gen: v5e
topology: v5e:2x2
jax: 0.10.0
libtpu: 0.0.40
codegen_flags: <defaults>
</compile_context>

<pallas_src>
import functools

import jax
import jax.numpy as jnp
from jax import lax
from jax.experimental import pallas as pl
from jax.experimental.pallas import tpu as pltpu


# ----------------------------- kernel bodies --------------------------------


def _conv_gn_core(x_ref, w_ref, b_ref, gamma_ref, beta_ref, mask_ref,
                  gm_ref, gmT_ref, xpad_ref, H, W, pad, fat_k):
    """3x3 (pre-standardized) conv + bias + GroupNorm affine for one image.

    x_ref:    (1, Cin, H*W) bf16        channel-major, spatially flattened
    w_ref:    (3, Cout, 3*Cin) bf16     (fat_k) or (3, 3, Cout, Cin) bf16
    mask_ref: (2, H*W) bf16             row 0: 0 where w == 0; row 1: 0 where w == W-1
    xpad_ref: (Cin, 2*pad + H*W) bf16   scratch; pad is lane-aligned and >= W+2

    Returns the normalized activations as a (Cout, H*W) f32 value; the caller
    adds scale/shift, activation and (optionally) the fused residual.
    """
    Cin = x_ref.shape[-2]
    Cout = b_ref.shape[0]
    Cg = Cout // gm_ref.shape[-1]
    HW = H * W

    # Vertical halo: keep the two 128-lane pads zeroed.  Only 2*pad lanes per
    # step (vs. the old full-scratch zero).  Done every step rather than once
    # under pl.when(program_id == 0) so it stays correct when the "parallel"
    # batch axis is split across TensorCores (each core has its own scratch).
    zeros_pad = jnp.zeros((Cin, pad), xpad_ref.dtype)
    xpad_ref[:, pl.ds(0, pad)] = zeros_pad
    xpad_ref[:, pl.ds(pad + HW, pad)] = zeros_pad

    # Lane-aligned, lane-dense copy of this image into the scratch interior
    # (interior fully overwritten every step; no masked/sublane-offset stores).
    xpad_ref[:, pl.ds(pad, HW)] = x_ref[0].astype(xpad_ref.dtype)

    # Horizontal halo: edge-column masks, precomputed in the wrapper.
    mask_l = mask_ref[0:1, :]                               # (1, HW)
    mask_r = mask_ref[1:2, :]                               # (1, HW)

    # 3x3 conv as shifted lane-window reads + MXU matmuls, f32 accumulation.
    acc = jnp.zeros((Cout, HW), jnp.float32)
    for kh in range(3):
        base = pad + (kh - 1) * W
        if fat_k:
            # Fat-K: concat the 3 kw taps on the sublane axis (K = 3*Cin).
            patch = jnp.concatenate(
                [xpad_ref[:, pl.ds(base - 1, HW)] * mask_l,
                 xpad_ref[:, pl.ds(base, HW)],
                 xpad_ref[:, pl.ds(base + 1, HW)] * mask_r], axis=0)
            acc = acc + jnp.dot(w_ref[kh], patch,
                                preferred_element_type=jnp.float32)
        else:
            # Large Cin: the MXU is already well fed at K = Cin; skip the concat.
            taps = (xpad_ref[:, pl.ds(base - 1, HW)] * mask_l,
                    xpad_ref[:, pl.ds(base, HW)],
                    xpad_ref[:, pl.ds(base + 1, HW)] * mask_r)
            for kw in range(3):
                acc = acc + jnp.dot(w_ref[kh, kw], taps[kw],
                                    preferred_element_type=jnp.float32)
    acc = acc + b_ref[...]                                  # (Cout, HW) + (Cout, 1)

    # GroupNorm: single-pass stats; the lane reduction rides the MXU via a
    # ones vector; group projection through hoisted one-hot matrices.
    # TODO(synk): two-pass / Welford for very large-magnitude activations.
    ones_col = jnp.ones((HW, 1), jnp.float32)
    inv_n = 1.0 / float(HW * Cg)
    s1 = jnp.dot(acc, ones_col, preferred_element_type=jnp.float32)        # (Cout, 1)
    s2 = jnp.dot(acc * acc, ones_col, preferred_element_type=jnp.float32)  # (Cout, 1)
    mean_g = jnp.dot(gmT_ref[...], s1, preferred_element_type=jnp.float32) * inv_n
    ex2_g = jnp.dot(gmT_ref[...], s2, preferred_element_type=jnp.float32) * inv_n
    inv_g = lax.rsqrt(ex2_g - mean_g * mean_g + 1e-5)                      # (G, 1)
    mean_c = jnp.dot(gm_ref[...], mean_g, preferred_element_type=jnp.float32)
    inv_c = jnp.dot(gm_ref[...], inv_g, preferred_element_type=jnp.float32)
    return (acc - mean_c) * (inv_c * gamma_ref[...]) + beta_ref[...]


def _block1_kernel(x_ref, w_ref, b_ref, gamma_ref, beta_ref, scale_ref,
                   shift_ref, mask_ref, gm_ref, gmT_ref, o_ref, xpad_ref,
                   *, H, W, pad, fat_k):
    # Conv + GroupNorm + (scale, shift) + SiLU.
    h = _conv_gn_core(x_ref, w_ref, b_ref, gamma_ref, beta_ref, mask_ref,
                      gm_ref, gmT_ref, xpad_ref, H, W, pad, fat_k)
    h = h * (scale_ref[0] + 1.0) + shift_ref[0]
    # Epilogue kept in f32 (v5e has no bf16 VPU/EUP); cast only at the store.
    o_ref[0] = (h * jax.nn.sigmoid(h)).astype(o_ref.dtype)


def _block2_res_kernel(h_ref, w_ref, b_ref, gamma_ref, beta_ref, xres_ref,
                       rw_ref, rb_ref, mask_ref, gm_ref, gmT_ref, o_ref,
                       xpad_ref, *, H, W, pad, fat_k):
    # Conv + GroupNorm + SiLU with the 1x1 residual conv + add fused in.
    h = _conv_gn_core(h_ref, w_ref, b_ref, gamma_ref, beta_ref, mask_ref,
                      gm_ref, gmT_ref, xpad_ref, H, W, pad, fat_k)
    h = h * jax.nn.sigmoid(h)
    res = jnp.dot(rw_ref[...], xres_ref[0],
                  preferred_element_type=jnp.float32) + rb_ref[...]
    o_ref[0] = (h + res).astype(o_ref.dtype)


# ------------------------------- wrappers ------------------------------------


def _compiler_params():
    # TODO(synk): budget vmem_limit_bytes per generation (<= ~48 MiB on v7x,
    # 96-112 MiB on v5e/v6e) once the 2-pass GroupNorm / spatial tiling lands.
    return pltpu.CompilerParams(
        dimension_semantics=("parallel",),        # batch iterations independent
        vmem_limit_bytes=48 * 1024 * 1024)


def _param_spec(arr):
    # Grid-invariant parameter: constant index_map (no re-DMA across steps)
    # and single buffering so it is not duplicated in VMEM.
    zeros = (0,) * arr.ndim
    return pl.BlockSpec(arr.shape, lambda bb, _z=zeros: _z,
                        pipeline_mode=pl.Buffered(1))


def weight_standardize(w_hwio, eps=1e-5):
    # Per-output-channel standardization over (kh, kw, in) — parameter glue.
    mean = w_hwio.mean(axis=(0, 1, 2), keepdims=True)
    var = w_hwio.var(axis=(0, 1, 2), keepdims=True)
    return (w_hwio - mean) * lax.rsqrt(var + eps)


def _prep_conv_weight(w_hwio):
    """Standardize and lay out as (3, Cout, 3*Cin) (fat-K) or (3, 3, Cout, Cin)."""
    cin, cout = w_hwio.shape[2], w_hwio.shape[3]
    w = jnp.transpose(weight_standardize(w_hwio), (0, 3, 1, 2))  # (3, Cout, 3, Cin)
    fat_k = (3 * cin) <= 128   # concat only while K stays under one MXU K tile
    if fat_k:
        w = w.reshape(3, cout, 3 * cin)       # K index = kw*Cin + cin
    else:
        w = jnp.transpose(w, (0, 2, 1, 3))    # (3, 3, Cout, Cin)
    return w.astype(jnp.bfloat16), fat_k


def conv_block1(x, w3, b, gamma, beta, scale, shift, masks, gm, gmT,
                *, H, W, pad, fat_k, out_dtype):
    B, Cin, HW = x.shape
    Cout = b.shape[0]
    kernel = functools.partial(_block1_kernel, H=H, W=W, pad=pad, fat_k=fat_k)
    return pl.pallas_call(
        kernel,
        out_shape=jax.ShapeDtypeStruct((B, Cout, HW), out_dtype),
        grid=(B,),
        in_specs=[
            pl.BlockSpec((1, Cin, HW), lambda bb: (bb, 0, 0)),
            _param_spec(w3),
            _param_spec(b),
            _param_spec(gamma),
            _param_spec(beta),
            pl.BlockSpec((1, Cout, 1), lambda bb: (bb, 0, 0)),
            pl.BlockSpec((1, Cout, 1), lambda bb: (bb, 0, 0)),
            _param_spec(masks),
            _param_spec(gm),
            _param_spec(gmT),
        ],
        out_specs=pl.BlockSpec((1, Cout, HW), lambda bb: (bb, 0, 0)),
        scratch_shapes=[pltpu.VMEM((Cin, 2 * pad + HW), jnp.bfloat16)],
        compiler_params=_compiler_params(),
    )(x, w3, b, gamma, beta, scale, shift, masks, gm, gmT)


def conv_block2_res(h, w3, b, gamma, beta, xres, rw, rb, masks, gm, gmT,
                    *, H, W, pad, fat_k):
    B, C, HW = h.shape
    Cout = b.shape[0]
    Cin_r = xres.shape[1]
    kernel = functools.partial(_block2_res_kernel, H=H, W=W, pad=pad,
                               fat_k=fat_k)
    return pl.pallas_call(
        kernel,
        out_shape=jax.ShapeDtypeStruct((B, Cout, HW), jnp.float32),
        grid=(B,),
        in_specs=[
            pl.BlockSpec((1, C, HW), lambda bb: (bb, 0, 0)),
            _param_spec(w3),
            _param_spec(b),
            _param_spec(gamma),
            _param_spec(beta),
            pl.BlockSpec((1, Cin_r, HW), lambda bb: (bb, 0, 0)),
            _param_spec(rw),
            _param_spec(rb),
            _param_spec(masks),
            _param_spec(gm),
            _param_spec(gmT),
        ],
        out_specs=pl.BlockSpec((1, Cout, HW), lambda bb: (bb, 0, 0)),
        scratch_shapes=[pltpu.VMEM((C, 2 * pad + HW), jnp.bfloat16)],
        compiler_params=_compiler_params(),
    )(h, w3, b, gamma, beta, xres, rw, rb, masks, gm, gmT)


def resnet_block(x_nchw, time_emb, p, groups):
    """ResnetBlock.forward(x, time_emb).  x: NCHW float32, returns NCHW f32."""
    B, Cin, H, W = x_nchw.shape
    Cout = p["conv1_w"].shape[-1]
    HW = H * W
    assert Cout % groups == 0, "GroupNorm requires dim_out % groups == 0"
    pad = ((W + 2 + 127) // 128) * 128        # lane-aligned halo pad (>= W + 2)

    # Native NCHW, spatially flattened (free reshape — no HBM transpose pass).
    # Single bf16 cast shared by the block-1 conv and the block-2 residual.
    x_bf = x_nchw.reshape(B, Cin, HW).astype(jnp.bfloat16)

    # Horizontal-halo edge masks, hoisted out of the kernels.
    col = jnp.arange(HW, dtype=jnp.int32) % W
    masks = jnp.stack([col != 0, col != W - 1], axis=0).astype(jnp.bfloat16)

    # Group-membership one-hot matrices, hoisted out of the kernels.
    Cg = Cout // groups
    gm = (jnp.arange(Cout)[:, None] // Cg ==
          jnp.arange(groups)[None, :]).astype(jnp.float32)       # (Cout, G)
    gmT = gm.T                                                    # (G, Cout)

    # Time MLP (SiLU -> Linear) in plain JAX: tiny matmul, XLA fuses it.
    t = time_emb * jax.nn.sigmoid(time_emb)
    ss = t @ p["mlp_w"] + p["mlp_b"]
    scale = ss[:, :Cout].reshape(B, Cout, 1)
    shift = ss[:, Cout:].reshape(B, Cout, 1)

    w1, fat1 = _prep_conv_weight(p["conv1_w"])
    w2, fat2 = _prep_conv_weight(p["conv2_w"])
    b1 = p["conv1_b"].reshape(Cout, 1)
    b2 = p["conv2_b"].reshape(Cout, 1)
    g1, be1 = p["gn1_g"].reshape(Cout, 1), p["gn1_b"].reshape(Cout, 1)
    g2, be2 = p["gn2_g"].reshape(Cout, 1), p["gn2_b"].reshape(Cout, 1)

    # Residual path: 1x1 conv when dim != dim_out, else identity (eye/zeros
    # reproduces nn.Identity through the same fused matmul path).
    if "res_w" in p:
        rw = p["res_w"].T.astype(jnp.bfloat16)                    # (Cout, Cin)
        rb = p["res_b"].reshape(Cout, 1)
    else:
        rw = jnp.eye(Cout, dtype=jnp.bfloat16)
        rb = jnp.zeros((Cout, 1), jnp.float32)

    # Block 1: conv + GN + (scale, shift) + SiLU.  h kept bf16 (it only feeds
    # bf16 MXU matmuls in block 2), lane-dense (Cout, HW) layout.
    h = conv_block1(x_bf, w1, b1, g1, be1, scale, shift, masks, gm, gmT,
                    H=H, W=W, pad=pad, fat_k=fat1, out_dtype=jnp.bfloat16)

    # Block 2: conv + GN + SiLU with the residual 1x1 conv + add fused in.
    out = conv_block2_res(h, w2, b2, g2, be2, x_bf, rw, rb, masks, gm, gmT,
                          H=H, W=W, pad=pad, fat_k=fat2)
    return out.reshape(B, Cout, H, W)


# ------------------------- pure-JAX f32 reference ----------------------------


def ref_resnet_block(x, time_emb, p, groups):
    def ws(w_hwio):
        m = w_hwio.mean(axis=(0, 1, 2), keepdims=True)
        v = w_hwio.var(axis=(0, 1, 2), keepdims=True)
        return (w_hwio - m) * lax.rsqrt(v + 1e-5)

    def conv3x3(xx, w_hwio, b):
        y = lax.conv_general_dilated(xx, w_hwio, (1, 1), ((1, 1), (1, 1)),
                                     dimension_numbers=("NCHW", "HWIO", "NCHW"))
        return y + b[None, :, None, None]

    def gn(xx, g, b):
        B, C, H, W = xx.shape
        xg = xx.reshape(B, groups, C // groups, H, W)
        m = xg.mean(axis=(2, 3, 4), keepdims=True)
        v = xg.var(axis=(2, 3, 4), keepdims=True)
        xn = ((xg - m) / jnp.sqrt(v + 1e-5)).reshape(B, C, H, W)
        return xn * g[None, :, None, None] + b[None, :, None, None]

    silu = lambda z: z * jax.nn.sigmoid(z)
    Cout = p["conv1_w"].shape[-1]
    t = silu(time_emb) @ p["mlp_w"] + p["mlp_b"]
    scale = t[:, :Cout, None, None]
    shift = t[:, Cout:, None, None]
    h = gn(conv3x3(x, ws(p["conv1_w"]), p["conv1_b"]), p["gn1_g"], p["gn1_b"])
    h = silu(h * (scale + 1.0) + shift)
    h = silu(gn(conv3x3(h, ws(p["conv2_w"]), p["conv2_b"]), p["gn2_g"], p["gn2_b"]))
    res = lax.conv_general_dilated(x, p["res_w"][None, None], (1, 1), ((0, 0), (0, 0)),
                                   dimension_numbers=("NCHW", "HWIO", "NCHW"))
    res = res + p["res_b"][None, :, None, None]
    return h + res


# --------------------------------- main ---------------------------------------


if __name__ == "__main__":
    B, dim, dim_out, H, W = 2, 4, 8, 16, 16
    groups, time_emb_dim = 4, 32

    ks = jax.random.split(jax.random.PRNGKey(0), 12)
    p = {
        "conv1_w": 0.2 * jax.random.normal(ks[0], (3, 3, dim, dim_out), jnp.float32),
        "conv1_b": 0.1 * jax.random.normal(ks[1], (dim_out,), jnp.float32),
        "gn1_g": 1.0 + 0.1 * jax.random.normal(ks[2], (dim_out,), jnp.float32),
        "gn1_b": 0.1 * jax.random.normal(ks[3], (dim_out,), jnp.float32),
        "conv2_w": 0.2 * jax.random.normal(ks[4], (3, 3, dim_out, dim_out), jnp.float32),
        "conv2_b": 0.1 * jax.random.normal(ks[5], (dim_out,), jnp.float32),
        "gn2_g": 1.0 + 0.1 * jax.random.normal(ks[6], (dim_out,), jnp.float32),
        "gn2_b": 0.1 * jax.random.normal(ks[7], (dim_out,), jnp.float32),
        "mlp_w": 0.1 * jax.random.normal(ks[8], (time_emb_dim, 2 * dim_out), jnp.float32),
        "mlp_b": 0.1 * jax.random.normal(ks[9], (2 * dim_out,), jnp.float32),
        "res_w": 0.2 * jax.random.normal(ks[10], (dim, dim_out), jnp.float32),
        "res_b": 0.1 * jax.random.normal(ks[11], (dim_out,), jnp.float32),
    }

    x = jax.random.normal(jax.random.PRNGKey(1), (B, dim, H, W), jnp.float32)
    t = jax.random.normal(jax.random.PRNGKey(2), (B, time_emb_dim), jnp.float32)

    out = jax.block_until_ready(resnet_block(x, t, p, groups))
    ref = jax.block_until_ready(ref_resnet_block(x, t, p, groups))

    assert out.shape == (B, dim_out, H, W), out.shape
    # bf16 MXU inputs (f32 accumulation) vs. a pure-f32 reference: relaxed
    # tolerance accounts for bf16 rounding through two conv+GroupNorm stages.
    max_err = float(jnp.max(jnp.abs(out - ref)))
    assert max_err < 6e-2, f"max abs err {max_err}"
    print("KERNEL_OK")
</pallas_src>

<mosaic_0001>
module attributes {stable_mosaic.version = 11 : i64} {
  func.func @_block1_kernel(%arg0: i32, %arg1: memref<1x4x256xbf16, #tpu.memory_space<vmem>>, %arg2: memref<3x8x12xbf16, #tpu.memory_space<vmem>>, %arg3: memref<8x1xf32, #tpu.memory_space<vmem>>, %arg4: memref<8x1xf32, #tpu.memory_space<vmem>>, %arg5: memref<8x1xf32, #tpu.memory_space<vmem>>, %arg6: memref<1x8x1xf32, #tpu.memory_space<vmem>>, %arg7: memref<1x8x1xf32, #tpu.memory_space<vmem>>, %arg8: memref<2x256xbf16, #tpu.memory_space<vmem>>, %arg9: memref<8x4xf32, #tpu.memory_space<vmem>>, %arg10: memref<4x8xf32, #tpu.memory_space<vmem>>, %arg11: memref<1x8x256xbf16, #tpu.memory_space<vmem>>, %arg12: memref<4x512xbf16, #tpu.memory_space<vmem>>) attributes {dimension_semantics = [#tpu.dimension_semantics<parallel>], iteration_bounds = array<i64: 2>, scalar_prefetch = 0 : i64, scratch_operands = 1 : i64, tpu.core_type = #tpu.core_type<tc>, window_params = [{transform_indices = @transform_0, window_bounds = array<i64: 1, 4, 256>}, {pipeline_mode = #tpu.pipeline_mode<synchronous>, transform_indices = @transform_1, window_bounds = array<i64: 3, 8, 12>}, {pipeline_mode = #tpu.pipeline_mode<synchronous>, transform_indices = @transform_2, window_bounds = array<i64: 8, 1>}, {pipeline_mode = #tpu.pipeline_mode<synchronous>, transform_indices = @transform_3, window_bounds = array<i64: 8, 1>}, {pipeline_mode = #tpu.pipeline_mode<synchronous>, transform_indices = @transform_4, window_bounds = array<i64: 8, 1>}, {transform_indices = @transform_5, window_bounds = array<i64: 1, 8, 1>}, {transform_indices = @transform_6, window_bounds = array<i64: 1, 8, 1>}, {pipeline_mode = #tpu.pipeline_mode<synchronous>, transform_indices = @transform_7, window_bounds = array<i64: 2, 256>}, {pipeline_mode = #tpu.pipeline_mode<synchronous>, transform_indices = @transform_8, window_bounds = array<i64: 8, 4>}, {pipeline_mode = #tpu.pipeline_mode<synchronous>, transform_indices = @transform_9, window_bounds = array<i64: 4, 8>}, {transform_indices = @transform_10, window_bounds = array<i64: 1, 8, 256>}]} {
    %cst = arith.constant 0.000000e+00 : bf16
    %0 = vector.broadcast %cst : bf16 to vector<4x128xbf16>
    %c0 = arith.constant 0 : index
    %c0_0 = arith.constant 0 : index
    %1 = vector.load %arg12[%c0, %c0_0] : memref<4x512xbf16, #tpu.memory_space<vmem>>, vector<4x128xbf16>
    tpu.vector_store %arg12[%c0, %c0_0], %0 {strides = array<i32>} : memref<4x512xbf16, #tpu.memory_space<vmem>>, vector<4x128xbf16>,
    %c0_1 = arith.constant 0 : index
    %c384 = arith.constant 384 : index
    %2 = vector.load %arg12[%c0_1, %c384] : memref<4x512xbf16, #tpu.memory_space<vmem>>, vector<4x128xbf16>
    tpu.vector_store %arg12[%c0_1, %c384], %0 {strides = array<i32>} : memref<4x512xbf16, #tpu.memory_space<vmem>>, vector<4x128xbf16>,
    %c0_2 = arith.constant 0 : index
    %c0_3 = arith.constant 0 : index
    %c0_4 = arith.constant 0 : index
    %3 = vector.load %arg1[%c0_2, %c0_3, %c0_4] : memref<1x4x256xbf16, #tpu.memory_space<vmem>>, vector<1x4x256xbf16>
    %4 = vector.shape_cast %3 : vector<1x4x256xbf16> to vector<4x256xbf16>
    %c0_5 = arith.constant 0 : index
    %c128 = arith.constant 128 : index
    %5 = vector.load %arg12[%c0_5, %c128] : memref<4x512xbf16, #tpu.memory_space<vmem>>, vector<4x256xbf16>
    tpu.vector_store %arg12[%c0_5, %c128], %4 {strides = array<i32>} : memref<4x512xbf16, #tpu.memory_space<vmem>>, vector<4x256xbf16>,
    %c0_6 = arith.constant 0 : index
    %c0_7 = arith.constant 0 : index
    %6 = vector.load %arg8[%c0_6, %c0_7] : memref<2x256xbf16, #tpu.memory_space<vmem>>, vector<1x256xbf16>
    %c1 = arith.constant 1 : index
    %c0_8 = arith.constant 0 : index
    %7 = vector.load %arg8[%c1, %c0_8] : memref<2x256xbf16, #tpu.memory_space<vmem>>, vector<1x256xbf16>
    %cst_9 = arith.constant 0.000000e+00 : f32
    %8 = vector.broadcast %cst_9 : f32 to vector<8x256xf32>
    %c0_10 = arith.constant 0 : index
    %c111 = arith.constant 111 : index
    %9 = vector.load %arg12[%c0_10, %c111] : memref<4x512xbf16, #tpu.memory_space<vmem>>, vector<4x256xbf16>
    %10 = vector.broadcast %6 : vector<1x256xbf16> to vector<4x256xbf16>
    %11 = arith.mulf %9, %10 : vector<4x256xbf16>
    %c0_11 = arith.constant 0 : index
    %c112 = arith.constant 112 : index
    %12 = vector.load %arg12[%c0_11, %c112] : memref<4x512xbf16, #tpu.memory_space<vmem>>, vector<4x256xbf16>
    %c0_12 = arith.constant 0 : index
    %c113 = arith.constant 113 : index
    %13 = vector.load %arg12[%c0_12, %c113] : memref<4x512xbf16, #tpu.memory_space<vmem>>, vector<4x256xbf16>
    %14 = vector.broadcast %7 : vector<1x256xbf16> to vector<4x256xbf16>
    %15 = arith.mulf %13, %14 : vector<4x256xbf16>
    %16 = tpu.concatenate %11, %12, %15 in 0 : vector<4x256xbf16>, vector<4x256xbf16>, vector<4x256xbf16> -> vector<12x256xbf16>
    %c0_13 = arith.constant 0 : index
    %c0_14 = arith.constant 0 : index
    %c0_15 = arith.constant 0 : index
    %17 = vector.load %arg2[%c0_13, %c0_14, %c0_15] : memref<3x8x12xbf16, #tpu.memory_space<vmem>>, vector<1x8x12xbf16>
    %18 = vector.shape_cast %17 : vector<1x8x12xbf16> to vector<8x12xbf16>
    %cst_16 = arith.constant dense<0.000000e+00> : vector<8x256xf32>
    %19 = tpu.matmul %18, %16, %cst_16 {dimension_numbers = #tpu.dot_dimension_numbers<[1], [0], [0], [1], [0, 0, 1, 1], [], []>} : vector<8x12xbf16>, vector<12x256xbf16>, vector<8x256xf32> -> vector<8x256xf32>
    %20 = arith.addf %8, %19 : vector<8x256xf32>
    %c0_17 = arith.constant 0 : index
    %c127 = arith.constant 127 : index
    %21 = vector.load %arg12[%c0_17, %c127] : memref<4x512xbf16, #tpu.memory_space<vmem>>, vector<4x256xbf16>
    %22 = vector.broadcast %6 : vector<1x256xbf16> to vector<4x256xbf16>
    %23 = arith.mulf %21, %22 : vector<4x256xbf16>
    %c0_18 = arith.constant 0 : index
    %c128_19 = arith.constant 128 : index
    %24 = vector.load %arg12[%c0_18, %c128_19] : memref<4x512xbf16, #tpu.memory_space<vmem>>, vector<4x256xbf16>
    %c0_20 = arith.constant 0 : index
    %c129 = arith.constant 129 : index
    %25 = vector.load %arg12[%c0_20, %c129] : memref<4x512xbf16, #tpu.memory_space<vmem>>, vector<4x256xbf16>
    %26 = vector.broadcast %7 : vector<1x256xbf16> to vector<4x256xbf16>
    %27 = arith.mulf %25, %26 : vector<4x256xbf16>
    %28 = tpu.concatenate %23, %24, %27 in 0 : vector<4x256xbf16>, vector<4x256xbf16>, vector<4x256xbf16> -> vector<12x256xbf16>
    %c1_21 = arith.constant 1 : index
    %c0_22 = arith.constant 0 : index
    %c0_23 = arith.constant 0 : index
    %29 = vector.load %arg2[%c1_21, %c0_22, %c0_23] : memref<3x8x12xbf16, #tpu.memory_space<vmem>>, vector<1x8x12xbf16>
    %30 = vector.shape_cast %29 : vector<1x8x12xbf16> to vector<8x12xbf16>
    %cst_24 = arith.constant dense<0.000000e+00> : vector<8x256xf32>
    %31 = tpu.matmul %30, %28, %cst_24 {dimension_numbers = #tpu.dot_dimension_numbers<[1], [0], [0], [1], [0, 0, 1, 1], [], []>} : vector<8x12xbf16>, vector<12x256xbf16>, vector<8x256xf32> -> vector<8x256xf32>
    %32 = arith.addf %20, %31 : vector<8x256xf32>
    %c0_25 = arith.constant 0 : index
    %c143 = arith.constant 143 : index
    %33 = vector.load %arg12[%c0_25, %c143] : memref<4x512xbf16, #tpu.memory_space<vmem>>, vector<4x256xbf16>
    %34 = vector.broadcast %6 : vector<1x256xbf16> to vector<4x256xbf16>
    %35 = arith.mulf %33, %34 : vector<4x256xbf16>
    %c0_26 = arith.constant 0 : index
    %c144 = arith.constant 144 : index
    %36 = vector.load %arg12[%c0_26, %c144] : memref<4x512xbf16, #tpu.memory_space<vmem>>, vector<4x256xbf16>
    %c0_27 = arith.constant 0 : index
    %c145 = arith.constant 145 : index
    %37 = vector.load %arg12[%c0_27, %c145] : memref<4x512xbf16, #tpu.memory_space<vmem>>, vector<4x256xbf16>
    %38 = vector.broadcast %7 : vector<1x256xbf16> to vector<4x256xbf16>
    %39 = arith.mulf %37, %38 : vector<4x256xbf16>
    %40 = tpu.concatenate %35, %36, %39 in 0 : vector<4x256xbf16>, vector<4x256xbf16>, vector<4x256xbf16> -> vector<12x256xbf16>
    %c2 = arith.constant 2 : index
    %c0_28 = arith.constant 0 : index
    %c0_29 = arith.constant 0 : index
    %41 = vector.load %arg2[%c2, %c0_28, %c0_29] : memref<3x8x12xbf16, #tpu.memory_space<vmem>>, vector<1x8x12xbf16>
    %42 = vector.shape_cast %41 : vector<1x8x12xbf16> to vector<8x12xbf16>
    %cst_30 = arith.constant dense<0.000000e+00> : vector<8x256xf32>
    %43 = tpu.matmul %42, %40, %cst_30 {dimension_numbers = #tpu.dot_dimension_numbers<[1], [0], [0], [1], [0, 0, 1, 1], [], []>} : vector<8x12xbf16>, vector<12x256xbf16>, vector<8x256xf32> -> vector<8x256xf32>
    %44 = arith.addf %32, %43 : vector<8x256xf32>
    %c0_31 = arith.constant 0 : index
    %c0_32 = arith.constant 0 : index
    %45 = vector.load %arg3[%c0_31, %c0_32] : memref<8x1xf32, #tpu.memory_space<vmem>>, vector<8x1xf32>
    %46 = vector.broadcast %45 : vector<8x1xf32> to vector<8x256xf32>
    %47 = arith.addf %44, %46 : vector<8x256xf32>
    %cst_33 = arith.constant 1.000000e+00 : f32
    %48 = vector.broadcast %cst_33 : f32 to vector<256x1xf32>
    %cst_34 = arith.constant dense<0.000000e+00> : vector<8x1xf32>
    %49 = tpu.matmul %47, %48, %cst_34 {dimension_numbers = #tpu.dot_dimension_numbers<[1], [0], [0], [1], [0, 0, 1, 1], [], []>} : vector<8x256xf32>, vector<256x1xf32>, vector<8x1xf32> -> vector<8x1xf32>
    %50 = arith.mulf %47, %47 : vector<8x256xf32>
    %cst_35 = arith.constant dense<0.000000e+00> : vector<8x1xf32>
    %51 = tpu.matmul %50, %48, %cst_35 {dimension_numbers = #tpu.dot_dimension_numbers<[1], [0], [0], [1], [0, 0, 1, 1], [], []>} : vector<8x256xf32>, vector<256x1xf32>, vector<8x1xf32> -> vector<8x1xf32>
    %c0_36 = arith.constant 0 : index
    %c0_37 = arith.constant 0 : index
    %52 = vector.load %arg10[%c0_36, %c0_37] : memref<4x8xf32, #tpu.memory_space<vmem>>, vector<4x8xf32>
    %cst_38 = arith.constant dense<0.000000e+00> : vector<4x1xf32>
    %53 = tpu.matmul %52, %49, %cst_38 {dimension_numbers = #tpu.dot_dimension_numbers<[1], [0], [0], [1], [0, 0, 1, 1], [], []>} : vector<4x8xf32>, vector<8x1xf32>, vector<4x1xf32> -> vector<4x1xf32>
    %cst_39 = arith.constant 0.001953125 : f32
    %54 = vector.broadcast %cst_39 : f32 to vector<4x1xf32>
    %55 = arith.mulf %53, %54 : vector<4x1xf32>
    %c0_40 = arith.constant 0 : index
    %c0_41 = arith.constant 0 : index
    %56 = vector.load %arg10[%c0_40, %c0_41] : memref<4x8xf32, #tpu.memory_space<vmem>>, vector<4x8xf32>
    %cst_42 = arith.constant dense<0.000000e+00> : vector<4x1xf32>
    %57 = tpu.matmul %56, %51, %cst_42 {dimension_numbers = #tpu.dot_dimension_numbers<[1], [0], [0], [1], [0, 0, 1, 1], [], []>} : vector<4x8xf32>, vector<8x1xf32>, vector<4x1xf32> -> vector<4x1xf32>
    %cst_43 = arith.constant 0.001953125 : f32
    %58 = vector.broadcast %cst_43 : f32 to vector<4x1xf32>
    %59 = arith.mulf %57, %58 : vector<4x1xf32>
    %60 = arith.mulf %55, %55 : vector<4x1xf32>
    %61 = arith.subf %59, %60 : vector<4x1xf32>
    %cst_44 = arith.constant 9.99999974E-6 : f32
    %62 = vector.broadcast %cst_44 : f32 to vector<4x1xf32>
    %63 = arith.addf %61, %62 : vector<4x1xf32>
    %64 = math.rsqrt %63 : vector<4x1xf32>
    %c0_45 = arith.constant 0 : index
    %c0_46 = arith.constant 0 : index
    %65 = vector.load %arg9[%c0_45, %c0_46] : memref<8x4xf32, #tpu.memory_space<vmem>>, vector<8x4xf32>
    %cst_47 = arith.constant dense<0.000000e+00> : vector<8x1xf32>
    %66 = tpu.matmul %65, %55, %cst_47 {dimension_numbers = #tpu.dot_dimension_numbers<[1], [0], [0], [1], [0, 0, 1, 1], [], []>} : vector<8x4xf32>, vector<4x1xf32>, vector<8x1xf32> -> vector<8x1xf32>
    %c0_48 = arith.constant 0 : index
    %c0_49 = arith.constant 0 : index
    %67 = vector.load %arg9[%c0_48, %c0_49] : memref<8x4xf32, #tpu.memory_space<vmem>>, vector<8x4xf32>
    %cst_50 = arith.constant dense<0.000000e+00> : vector<8x1xf32>
    %68 = tpu.matmul %67, %64, %cst_50 {dimension_numbers = #tpu.dot_dimension_numbers<[1], [0], [0], [1], [0, 0, 1, 1], [], []>} : vector<8x4xf32>, vector<4x1xf32>, vector<8x1xf32> -> vector<8x1xf32>
    %69 = vector.broadcast %66 : vector<8x1xf32> to vector<8x256xf32>
    %70 = arith.subf %47, %69 : vector<8x256xf32>
    %c0_51 = arith.constant 0 : index
    %c0_52 = arith.constant 0 : index
    %71 = vector.load %arg4[%c0_51, %c0_52] : memref<8x1xf32, #tpu.memory_space<vmem>>, vector<8x1xf32>
    %72 = arith.mulf %68, %71 : vector<8x1xf32>
    %73 = vector.broadcast %72 : vector<8x1xf32> to vector<8x256xf32>
    %74 = arith.mulf %70, %73 : vector<8x256xf32>
    %c0_53 = arith.constant 0 : index
    %c0_54 = arith.constant 0 : index
    %75 = vector.load %arg5[%c0_53, %c0_54] : memref<8x1xf32, #tpu.memory_space<vmem>>, vector<8x1xf32>
    %76 = vector.broadcast %75 : vector<8x1xf32> to vector<8x256xf32>
    %77 = arith.addf %74, %76 : vector<8x256xf32>
    %c0_55 = arith.constant 0 : index
    %c0_56 = arith.constant 0 : index
    %c0_57 = arith.constant 0 : index
    %78 = vector.load %arg6[%c0_55, %c0_56, %c0_57] : memref<1x8x1xf32, #tpu.memory_space<vmem>>, vector<1x8x1xf32>
    %79 = vector.shape_cast %78 : vector<1x8x1xf32> to vector<8x1xf32>
    %cst_58 = arith.constant 1.000000e+00 : f32
    %80 = vector.broadcast %cst_58 : f32 to vector<8x1xf32>
    %81 = arith.addf %79, %80 : vector<8x1xf32>
    %82 = vector.broadcast %81 : vector<8x1xf32> to vector<8x256xf32>
    %83 = arith.mulf %77, %82 : vector<8x256xf32>
    %c0_59 = arith.constant 0 : index
    %c0_60 = arith.constant 0 : index
    %c0_61 = arith.constant 0 : index
    %84 = vector.load %arg7[%c0_59, %c0_60, %c0_61] : memref<1x8x1xf32, #tpu.memory_space<vmem>>, vector<1x8x1xf32>
    %85 = vector.shape_cast %84 : vector<1x8x1xf32> to vector<8x1xf32>
    %86 = vector.broadcast %85 : vector<8x1xf32> to vector<8x256xf32>
    %87 = arith.addf %83, %86 : vector<8x256xf32>
    %88 = arith.negf %87 : vector<8x256xf32>
    %89 = math.exp %88 : vector<8x256xf32>
    %cst_62 = arith.constant 1.000000e+00 : f32
    %90 = vector.broadcast %cst_62 : f32 to vector<8x256xf32>
    %91 = arith.addf %90, %89 : vector<8x256xf32>
    %92 = arith.divf %90, %91 : vector<8x256xf32>
    %93 = arith.mulf %87, %92 : vector<8x256xf32>
    %94 = arith.truncf %93 : vector<8x256xf32> to vector<8x256xbf16>
    %c0_63 = arith.constant 0 : index
    %c0_64 = arith.constant 0 : index
    %c0_65 = arith.constant 0 : index
    %95 = vector.load %arg11[%c0_63, %c0_64, %c0_65] : memref<1x8x256xbf16, #tpu.memory_space<vmem>>, vector<1x8x256xbf16>
    %96 = vector.shape_cast %95 : vector<1x8x256xbf16> to vector<8x256xbf16>
    %97 = vector.shape_cast %94 : vector<8x256xbf16> to vector<1x8x256xbf16>
    tpu.vector_store %arg11[%c0_63, %c0_64, %c0_65], %97 {strides = array<i32>} : memref<1x8x256xbf16, #tpu.memory_space<vmem>>, vector<1x8x256xbf16>,
    return
  }
  func.func @transform_0(%arg0: i32) -> (i32, i32, i32) {
    %c0_i32 = arith.constant 0 : i32
    %c0_i32_0 = arith.constant 0 : i32
    %c0_i32_1 = arith.constant 0 : i32
    return %arg0, %c0_i32, %c0_i32_0 : i32, i32, i32
  }
  func.func @transform_1(%arg0: i32) -> (i32, i32, i32) {
    %c0_i32 = arith.constant 0 : i32
    %c0_i32_0 = arith.constant 0 : i32
    %c0_i32_1 = arith.constant 0 : i32
    %c0_i32_2 = arith.constant 0 : i32
    return %c0_i32, %c0_i32_0, %c0_i32_1 : i32, i32, i32
  }
  func.func @transform_2(%arg0: i32) -> (i32, i32) {
    %c0_i32 = arith.constant 0 : i32
    %c0_i32_0 = arith.constant 0 : i32
    %c0_i32_1 = arith.constant 0 : i32
    return %c0_i32, %c0_i32_0 : i32, i32
  }
  func.func @transform_3(%arg0: i32) -> (i32, i32) {
    %c0_i32 = arith.constant 0 : i32
    %c0_i32_0 = arith.constant 0 : i32
    %c0_i32_1 = arith.constant 0 : i32
    return %c0_i32, %c0_i32_0 : i32, i32
  }
  func.func @transform_4(%arg0: i32) -> (i32, i32) {
    %c0_i32 = arith.constant 0 : i32
    %c0_i32_0 = arith.constant 0 : i32
    %c0_i32_1 = arith.constant 0 : i32
    return %c0_i32, %c0_i32_0 : i32, i32
  }
  func.func @transform_5(%arg0: i32) -> (i32, i32, i32) {
    %c0_i32 = arith.constant 0 : i32
    %c0_i32_0 = arith.constant 0 : i32
    %c0_i32_1 = arith.constant 0 : i32
    return %arg0, %c0_i32, %c0_i32_0 : i32, i32, i32
  }
  func.func @transform_6(%arg0: i32) -> (i32, i32, i32) {
    %c0_i32 = arith.constant 0 : i32
    %c0_i32_0 = arith.constant 0 : i32
    %c0_i32_1 = arith.constant 0 : i32
    return %arg0, %c0_i32, %c0_i32_0 : i32, i32, i32
  }
  func.func @transform_7(%arg0: i32) -> (i32, i32) {
    %c0_i32 = arith.constant 0 : i32
    %c0_i32_0 = arith.constant 0 : i32
    %c0_i32_1 = arith.constant 0 : i32
    return %c0_i32, %c0_i32_0 : i32, i32
  }
  func.func @transform_8(%arg0: i32) -> (i32, i32) {
    %c0_i32 = arith.constant 0 : i32
    %c0_i32_0 = arith.constant 0 : i32
    %c0_i32_1 = arith.constant 0 : i32
    return %c0_i32, %c0_i32_0 : i32, i32
  }
  func.func @transform_9(%arg0: i32) -> (i32, i32) {
    %c0_i32 = arith.constant 0 : i32
    %c0_i32_0 = arith.constant 0 : i32
    %c0_i32_1 = arith.constant 0 : i32
    return %c0_i32, %c0_i32_0 : i32, i32
  }
  func.func @transform_10(%arg0: i32) -> (i32, i32, i32) {
    %c0_i32 = arith.constant 0 : i32
    %c0_i32_0 = arith.constant 0 : i32
    %c0_i32_1 = arith.constant 0 : i32
    return %arg0, %c0_i32, %c0_i32_0 : i32, i32, i32
  }
}

</mosaic_0001>

<bundles_post_ra>
// kernel: tpu_custom_call.1
= control target key start
LH: loop header
LB: loop body
LE: loop exit
PB: predicated region body
PF: predicated region fallthrough
CT: control target
= control target key end

     0   :  { %15 = vsyncpa [#allocation4], 0  ;;  %s1819_s0 = inlined_call_operand.vmem [shape: bf16[2,4,256], index: 0, kind: input, shape index: {}]   ;;  %s1820_s1 = inlined_call_operand.vmem [shape: bf16[3,8,12], index: 1, kind: input, shape index: {}]   ;;  %s1821_s2 = inlined_call_operand.vmem [shape: f32[8,1], index: 2, kind: input, shape index: {}]   ;;  %s1822_s3 = inlined_call_operand.vmem [shape: f32[8,1], index: 3, kind: input, shape index: {}]   ;;  %s1823_s4 = inlined_call_operand.vmem [shape: f32[8,1], index: 4, kind: input, shape index: {}]   ;;  %s1824_s5 = inlined_call_operand.vmem [shape: f32[2,8,1], index: 5, kind: input, shape index: {}]   ;;  %s1825_s6 = inlined_call_operand.vmem [shape: f32[2,8,1], index: 6, kind: input, shape index: {}]   ;;  %s1826_s7 = inlined_call_operand.vmem [shape: bf16[2,256], index: 7, kind: input, shape index: {}]   ;;  %s1827_s8 = inlined_call_operand.vmem [shape: f32[8,4], index: 8, kind: input, shape index: {}]   ;;  %s1828_s9 = inlined_call_operand.vmem [shape: f32[4,8], index: 9, kind: input, shape index: {}]   ;;  %s1829_s10 = inlined_call_operand.hbm [shape: bf16[2,8,256], index: 10, kind: output, shape index: {}]  }
   0x1   :  { %17 = vsyncpa [#allocation4 + $0x1], 0  ;;  %s1504_s13 = smov 0   ;;  %s1506_s14 = smov 0  }
   0x2   :  { %s1508_s15 = smov 0   ;;  %s1510_s16 = smov 0  }
   0x3 LB: > { %s1525_s17 = sadd.s32 4294967295, %s1438_s16   ;;  %s1283_s18 = sadd.s32 4294967294, %s1438_s16   ;;  %s1438_s16 = sphi %s1510_s16, %s1835_s16   ;;  %s1434_s15 = sphi %s1508_s15, %s1834_s15   ;;  %s1430_s14 = sphi %s1506_s14, %s1833_s14   ;;  %s1426_s13 = sphi %s1504_s13, %s1832_s13  }
   0x4   : > { %s1529_s19 = sadd.s32 1, %s1438_s16   ;;  %s255_s20 = sadd.s32 1, %s1434_s15 }
   0x5   : > { %s252_s21 = ssub.s32 %s1438_s16, %s1529_s19  ;;  %p265_p0 = scmp.ne.s32.totalorder %s1434_s15, %s1430_s14 }
   0x6   : > { %p253_p1 = scmp.eq.s32.totalorder %s252_s21, 0  ;;  %p266_p2 = scmp.eq.s32.totalorder %s1525_s17, 1 }
   0x7   : > { %p271_p3 = scmp.ne.s32.totalorder %s1430_s14, %s1426_s13  ;;  %p272_p4 = scmp.eq.s32.totalorder %s1283_s18, 1 }
   0x8   : > { %s1540_s22 = scalar_select %p253_p1, %s1434_s15, %s255_s20  }
   0x9   : > { %p1542_p5 = por %p266_p2, %p265_p0  ;;  %p1546_p6 = por %p272_p4, %p271_p3 }
   0xa   : > { %p1286_p7 = scmp.ge.s32.totalorder %s1438_s16, 1  ;;  %p333_p8 = scmp.lt.s32.totalorder %s1438_s16, 3 }
   0xc   : > { %p334_p9 = pnand %p1286_p7, %p333_p8 }
   0xd   : > { %s1440_s27 = smov (!%p334_p9), 111   ;;  %s1441_s28 = smov (!%p334_p9), 15  }
   0xe   : > { %337 = sbr.rel (%p334_p9) target bundleno = 1339 (0x53b), region = 60  ;;  %s1442_s29 = smov (!%p334_p9), 127  }
   0xf   : > { %p379_p10 = scmp.lt.s32.totalorder (!%p334_p9), %s1525_s17, 1  ;;  %s1444_s21 = smov (!%p334_p9), 17  }
  0x10   : > { %s1445_s25 = smov (!%p334_p9), 1   ;;  %s1446_s26 = smov (!%p334_p9), 113  }
  0x11   : > { %s1314_s18 = sshll.u32 (!%p334_p9), %s1525_s17, 3 }
  0x13   : > { %v397_v0 = vld [vmem:[%s1826_s7] sm:$0x3]  ;;  %vm416_vm0 = vcmask 1043456   ;;  %s1559_s30 = scalar_select %p379_p10, %s1525_s17, 1  ;;  %v1443_v12 = vmov 0   ;;  %vm421_vm1 = vcmask 908288  }
  0x14   : > { %400 = vst [vmem:[#allocation1] ss:$9 sm:$0xff] %v397_v0  ;;  %1363 = vset.pattern.permute.xlu2 %v1443_v12  ;;  %1364 = vset.pattern.permute.xlu0 %v1443_v12  ;;  %vm463_vm2 = vcmask 924672   ;;  %vm505_vm3 = vcmask 1039360   ;;  %vm574_vm4 = vcmask 7168   ;;  %vm748_vm5 = vcmask 121856  }
  0x15   : > { %s1313_s11 = sshll.u32 %s1559_s30, 2  ;;  %393 = vst [vmem:[#allocation2] sm:$0x3] %v1443_v12  ;;  %1365 = vset.pattern.permute.xlu1 %v1443_v12  ;;  %vm704_vm6 = vcmask 138240   ;;  %vm522_vm7 = vcmask 1031168   ;;  %vm525_vm8 = vcmask 1041408  }
  0x16   : > { %s383_s20 = scalar_lea.vmem %s1819_s0, %s1313_s11  ;;  %394 = vst [vmem:[#allocation2 + $0x6] sm:$0x3] %v1443_v12  ;;  %vm662_vm9 = vcmask 1045504   ;;  %vm658_vm10 = vcmask 97280   ;;  %vm990_vm11 = vcmask 64512   ;;  %vm1050_vm12 = vcmask 31744  }
  0x17   : > { %v395_v11 = vld [vmem:[%s383_s20] sm:$0xf] }
  0x18   : > { %396 = vst [vmem:[#allocation2 + $0x2] sm:$0xf] %v395_v11 }
  0x1b   : > { %v401_v1 = vld [vmem:[#allocation1] sm:$0xff]  ;;  %v402_v2 = vld [vmem:[#allocation1 + $0x9] sm:$0xff] }
  0x1c   : > { %v403_v3 = vpack.i.b16 %v401_v1, %v401_v1  ;;  %v406_v4 = vpack.i.b16 %v402_v2, %v402_v2 }
  0x1e   : > { %v405_v5 = vperm.slane %v403_v3, 0  ;;  %v408_v6 = vperm.slane %v406_v4, 0 }
  0x1f   : > { %v398_v13 = vld [vmem:[#allocation2] sm:$0x3f] }
  0x20   : > { %v411_v7 = vunpack.c.l.bf16 %v405_v5  ;;  %v412_v8 = vunpack.c.l.bf16 %v408_v6  ;;  %v410_v14 = vunpack.c.h.bf16 %v398_v13  ;;  %v409_v16 = vunpack.c.l.bf16 %v398_v13  ;;  %v440_v36 = vld [vmem:[#allocation2] sm:$0x3f] }
  0x21   : > { %v453_v37 = vunpack.c.h.bf16 %v440_v36  ;;  %v452_v38 = vunpack.c.l.bf16 %v440_v36  ;;  %v542_v45 = vld [vmem:[#allocation2] sm:$0x3f] }
  0x22   : > { %v415_v9 = vrot.slane %v412_v8, 4  ;;  %v544_v49 = vunpack.c.h.bf16 %v542_v45  ;;  %v543_v53 = vunpack.c.l.bf16 %v542_v45  ;;  %v568_v57 = vld [vmem:[#allocation2 + $0x2] sm:$0x3f] }
  0x23   : > { %v569_v1 = vunpack.c.l.bf16 %v568_v57  ;;  %v742_v2 = vld [vmem:[#allocation2 + $0x2] sm:$0x3f] }
  0x24   : > { %v417_v10 = vsel %vm416_vm0, %v411_v7, %v415_v9  ;;  %v744_v7 = vunpack.c.h.bf16 %v742_v2 }
  0x25   : > { %418 = vrot.lane.b32.xlu0 %v417_v10, %s1440_s27  ;;  %745 = vrot.lane.b32.xlu2 %v417_v10, %s1441_s28  ;;  %s1447_s27 = smov 126  }
  0x26   : > { %545 = vrot.lane.b32.xlu1 %v417_v10, %s1442_s29 }
  0x7f   : > { %v746_v5 = vpop.permute.xlu2 %745 }
  0x80   : > { %v747_v8 = vrot.slane %v746_v5, 4 }
  0x82   : > { %v753_v13 = vmul.f32 %v747_v8, %v744_v7 }
  0x97   : > { %v419_v15 = vpop.permute.xlu0 %418 }
  0x98   : > { %v420_v17 = vrot.slane %v419_v15, 4  ;;  %v546_v44 = vpop.permute.xlu1 %545 }
  0x99   : > { %v547_v50 = vrot.slane %v546_v44, 4 }
  0x9a   : > { %v422_v18 = vsel %vm421_vm1, %v420_v17, %v419_v15  ;;  %v426_v19 = vmul.f32 %v420_v17, %v410_v14  ;;  %v567_v14 = vld [vmem:[#allocation2 + $0x2] sm:$0xf] }
  0x9b   : > { %v425_v20 = vmul.f32 %v422_v18, %v409_v16  ;;  %v549_v54 = vsel %vm505_vm3, %v547_v50, %v546_v44  ;;  %v553_v55 = vmul.f32 %v547_v50, %v544_v49 }
  0x9c   : > { %431 = vst [vmem:[#allocation1 + $0x10] ss:$2 sm:$0xff] %v426_v19  ;;  %v552_v59 = vmul.f32 %v549_v54, %v543_v53  ;;  %v767_v19 = vld [vmem:[#allocation2 + $0x2] sm:$0x3f] }
  0x9d   : > { %429 = vst [vmem:[#allocation1] ss:$2 sm:$0xff] %v425_v20 }
  0xa3   : > { %v1565_v21 = vld.sshfl [vmem:[#allocation1 + $0x10] sm:$0xff pattern:$0x75316420] }
  0xa4   : > { %v1567_v22 = vld.sshfl [vmem:[#allocation1] sm:$0xff pattern:$0x75316420]  ;;  %v1569_v23 = vld.sshfl [vmem:[#allocation1 + $0x8] sm:$0xff pattern:$0x75316420] }
  0xa5   : > { %441 = vst [vmem:[#allocation1] ss:$9 sm:$0xff] %v397_v0  ;;  %v570_v0 = vunpack.c.h.bf16 %v568_v57 }
  0xac   : > { %v443_v24 = vld [vmem:[#allocation1 + $0x9] sm:$0xff]  ;;  %v442_v25 = vld [vmem:[#allocation1] sm:$0xff] }
  0xad   : > { %v444_v26 = vshrl.u32 %v442_v25, 16  ;;  %v448_v27 = vshrl.u32 %v443_v24, 16 }
  0xaf   : > { %v445_v28 = vpack.i.b16 %v444_v26, %v444_v26  ;;  %v449_v29 = vpack.i.b16 %v448_v27, %v448_v27  ;;  %v743_v26 = vunpack.c.l.bf16 %v742_v2 }
  0xb1   : > { %v447_v30 = vperm.slane %v445_v28, 0  ;;  %v451_v31 = vperm.slane %v449_v29, 0 }
  0xb3   : > { %v455_v32 = vunpack.c.l.bf16 %v451_v31  ;;  %v454_v33 = vunpack.c.l.bf16 %v447_v30  ;;  %v749_v30 = vsel %vm748_vm5, %v747_v8, %v746_v5  ;;  %v769_v31 = vunpack.c.h.bf16 %v767_v19 }
  0xb5   : > { %v458_v34 = vrot.slane %v455_v32, 4 }
  0xb7   : > { %v459_v35 = vsel %vm416_vm0, %v454_v33, %v458_v34 }
  0xb8   : > { %770 = vrot.lane.b32.xlu2 %v459_v35, %s1444_s21  ;;  %571 = vrot.lane.b32.xlu1 %v459_v35, %s1445_s25 }
  0xb9   : > { %460 = vrot.lane.b32.xlu0 %v459_v35, %s1446_s26  ;;  %v752_v35 = vmul.f32 %v749_v30, %v743_v26 }
 0x112   : > { %v771_v20 = vpop.permute.xlu2 %770 }
 0x113   : > { %v772_v32 = vrot.slane %v771_v20, 4 }
 0x12a   : > { %v572_v58 = vpop.permute.xlu1 %571 }
 0x12b   : > { %v461_v39 = vpop.permute.xlu0 %460  ;;  %v573_v63 = vrot.slane %v572_v58, 4 }
 0x12c   : > { %v462_v40 = vrot.slane %v461_v39, 4 }
 0x12d   : > { %v575_v3 = vsel %vm574_vm4, %v573_v63, %v572_v58  ;;  %v579_v4 = vmul.f32 %v573_v63, %v570_v0 }
 0x12e   : > { %v464_v41 = vsel %vm463_vm2, %v462_v40, %v461_v39  ;;  %v468_v42 = vmul.f32 %v462_v40, %v453_v37  ;;  %v578_v9 = vmul.f32 %v575_v3, %v569_v1  ;;  %v768_v40 = vunpack.c.l.bf16 %v767_v19 }
 0x12f   : > { %v467_v43 = vmul.f32 %v464_v41, %v452_v38 }
 0x130   : > { %473 = vst [vmem:[#allocation1 + $0x10] ss:$2 sm:$0xff] %v468_v42  ;;  %v774_v42 = vsel %vm704_vm6, %v772_v32, %v771_v20 }
 0x131   : > { %471 = vst [vmem:[#allocation1] ss:$2 sm:$0xff] %v467_v43  ;;  %v777_v43 = vmul.f32 %v774_v42, %v768_v40 }
 0x137   : > { %v1576_v46 = vld.sshfl [vmem:[#allocation1 + $0x10] sm:$0xff pattern:$0x75316420] }
 0x138   : > { %v474_v47 = vld.sshfl [vmem:[#allocation1] sm:$0xff pattern:$0x75316420]  ;;  %v475_v48 = vld.sshfl [vmem:[#allocation1 + $0x8] sm:$0xff pattern:$0x75316420]  ;;  %v481_v41 = vpack.c.bf16 %v1576_v46, %v1576_v46 }
 0x139   : > { %v1578_v51 = vpack.c.bf16 %v475_v48, %v474_v47  ;;  %492 = vst [vmem:[#allocation1 + $0x1] ss:$4 sm:$0xff] %v440_v36  ;;  %v778_v36 = vmul.f32 %v772_v32, %v769_v31 }
 0x13a   : > { %v512_v44 = vunpack.c.l.b16 %v481_v41 }
 0x13b   : > { %v510_v52 = vunpack.c.l.b16 %v1578_v51  ;;  %v511_v48 = vunpack.c.h.b16 %v1578_v51 }
 0x13c   : > { %v515_v50 = vpack.c.b16 %v512_v44, %v512_v44 }
 0x13d   : > { %v513_v56 = vpack.c.b16 %v510_v52, %v510_v52  ;;  %v514_v52 = vpack.c.b16 %v511_v48, %v511_v48 }
 0x13f   : > { %516 = vrot.lane.b32.xlu2 %v513_v56, %s1447_s27 }
 0x140   : > { %v497_v60 = vld.sshfl [vmem:[#allocation1 + $0x10] sm:$0xff pattern:$0x73625140]  ;;  %v495_v61 = vld.sshfl [vmem:[#allocation1 + $0x8] sm:$0xff pattern:$0x73625140] }
 0x141   : > { %503 = vrot.lane.b32.xlu1 %v497_v60, %s1442_s29  ;;  %558 = vst [vmem:[#allocation1 + $0x10] ss:$2 sm:$0xff] %v553_v55  ;;  %501 = vrot.lane.b32.xlu0 %v495_v61, %s1442_s29  ;;  %v493_v62 = vld.sshfl [vmem:[#allocation1] sm:$0xff pattern:$0x73625140] }
 0x142   : > { %556 = vst [vmem:[#allocation1] ss:$2 sm:$0xff] %v552_v59 }
 0x147   : > { %499 = vrot.lane.b32.xlu2 %v493_v62, %s1442_s29 }
 0x148   : > { %v1587_v6 = vld.sshfl [vmem:[#allocation1 + $0x10] sm:$0xff pattern:$0x75316420] }
 0x149   : > { %584 = vst [vmem:[#allocation1 + $0x10] ss:$2 sm:$0xff] %v579_v4  ;;  %v559_v10 = vld.sshfl [vmem:[#allocation1] sm:$0xff pattern:$0x75316420]  ;;  %v566_v4 = vpack.c.bf16 %v1587_v6, %v1587_v6 }
 0x14a   : > { %v560_v11 = vld.sshfl [vmem:[#allocation1 + $0x8] sm:$0xff pattern:$0x75316420] }
 0x14b   : > { %582 = vst [vmem:[#allocation1] ss:$2 sm:$0xff] %v578_v9  ;;  %v1589_v12 = vpack.c.bf16 %v560_v11, %v559_v10  ;;  %v597_v9 = vunpack.c.l.b16 %v566_v4  ;;  %v439_v11 = vpack.c.bf16 %v1565_v21, %v1565_v21 }
 0x14d   : > { %v595_v10 = vunpack.c.l.b16 %v1589_v12 }
 0x14f   : > { %v598_v6 = vpack.c.b16 %v595_v10, %v595_v10 }
 0x150   : > { %v587_v15 = vld.sshfl [vmem:[#allocation1 + $0x10] sm:$0xff pattern:$0x75316420] }
 0x151   : > { %v592_v16 = vpack.c.bf16 %v587_v15, %v587_v15  ;;  %758 = vst [vmem:[#allocation1 + $0x10] ss:$2 sm:$0xff] %v753_v13  ;;  %v596_v13 = vunpack.c.h.b16 %v1589_v12 }
 0x152   : > { %v585_v17 = vld.sshfl [vmem:[#allocation1] sm:$0xff pattern:$0x75316420]  ;;  %v586_v18 = vld.sshfl [vmem:[#allocation1 + $0x8] sm:$0xff pattern:$0x75316420] }
 0x153   : > { %v617_v24 = vunpack.c.l.b16 %v592_v16  ;;  %v591_v25 = vpack.c.bf16 %v586_v18, %v585_v17  ;;  %603 = vst [vmem:[#allocation1 + $0x1] ss:$4 sm:$0xff] %v567_v14  ;;  %v600_v14 = vpack.c.b16 %v597_v9, %v597_v9  ;;  %v438_v18 = vpack.c.bf16 %v1569_v23, %v1567_v22 }
 0x155   : > { %v620_v27 = vpack.c.b16 %v617_v24, %v617_v24  ;;  %v616_v28 = vunpack.c.h.b16 %v591_v25  ;;  %v615_v29 = vunpack.c.l.b16 %v591_v25  ;;  %v599_v25 = vpack.c.b16 %v596_v13, %v596_v13 }
 0x156   : > { %v484_v23 = vunpack.c.l.b16 %v438_v18  ;;  %v485_v30 = vunpack.c.h.b16 %v438_v18 }
 0x157   : > { %625 = vrot.lane.b32.xlu1 %v620_v27, %s1447_s27  ;;  %v619_v33 = vpack.c.b16 %v616_v28, %v616_v28  ;;  %v618_v34 = vpack.c.b16 %v615_v29, %v615_v29 }
 0x159   : > { %623 = vrot.lane.b32.xlu0 %v619_v33, %s1447_s27  ;;  %621 = vrot.lane.b32.xlu2 %v618_v34, %s1447_s27 }
 0x15a   : > { %v606_v37 = vld.sshfl [vmem:[#allocation1 + $0x8] sm:$0xff pattern:$0x73625140]  ;;  %v604_v38 = vld.sshfl [vmem:[#allocation1] sm:$0xff pattern:$0x73625140] }
 0x15b   : > { %756 = vst [vmem:[#allocation1] ss:$2 sm:$0xff] %v752_v35  ;;  %v1594_v39 = vld.sshfl [vmem:[#allocation1 + $0x10] sm:$0xff pattern:$0x75316420] }
 0x15c   : > { %783 = vst [vmem:[#allocation1 + $0x10] ss:$2 sm:$0xff] %v778_v36 }
 0x15f   : > { %610 = vrot.lane.b32.xlu1 %v606_v37, %s1442_s29  ;;  %v487_v37 = vpack.c.b16 %v484_v23, %v484_v23 }
 0x161   : > { %608 = vrot.lane.b32.xlu0 %v604_v38, %s1442_s29  ;;  %v488_v38 = vpack.c.b16 %v485_v30, %v485_v30 }
 0x162   : > { %v759_v45 = vld.sshfl [vmem:[#allocation1] sm:$0xff pattern:$0x75316420]  ;;  %v760_v47 = vld.sshfl [vmem:[#allocation1 + $0x8] sm:$0xff pattern:$0x75316420] }
 0x163   : > { %781 = vst [vmem:[#allocation1] ss:$2 sm:$0xff] %v777_v43  ;;  %v1602_v49 = vpack.c.bf16 %v760_v47, %v759_v45  ;;  %v786_v46 = vld.sshfl [vmem:[#allocation1 + $0x10] sm:$0xff pattern:$0x75316420] }
 0x164   : > { %v791_v55 = vpack.c.bf16 %v786_v46, %v786_v46 }
 0x166   : > { %v821_v59 = vunpack.c.l.b16 %v791_v55  ;;  %v794_v55 = vunpack.c.l.b16 %v1602_v49 }
 0x167   : > { %520 = vrot.lane.b32.xlu1 %v515_v50, %s1447_s27  ;;  %v766_v50 = vpack.c.bf16 %v1594_v39, %v1594_v39 }
 0x168   : > { %v824_v62 = vpack.c.b16 %v821_v59, %v821_v59 }
 0x169   : > { %518 = vrot.lane.b32.xlu0 %v514_v52, %s1447_s27 }
 0x16a   : > { %v784_v53 = vld.sshfl [vmem:[#allocation1] sm:$0xff pattern:$0x75316420]  ;;  %v785_v54 = vld.sshfl [vmem:[#allocation1 + $0x8] sm:$0xff pattern:$0x75316420] }
 0x16b   : > { %802 = vst [vmem:[#allocation1 + $0x1] ss:$4 sm:$0xff] %v767_v19  ;;  %v790_v56 = vpack.c.bf16 %v785_v54, %v784_v53  ;;  %v486_v19 = vunpack.c.l.b16 %v439_v11  ;;  %v796_v53 = vunpack.c.l.b16 %v766_v50  ;;  %v795_v54 = vunpack.c.h.b16 %v1602_v49 }
 0x16d   : > { %v820_v60 = vunpack.c.h.b16 %v790_v56  ;;  %v819_v61 = vunpack.c.l.b16 %v790_v56  ;;  %v489_v31 = vpack.c.b16 %v486_v19, %v486_v19 }
 0x16f   : > { %v823_v63 = vpack.c.b16 %v820_v60, %v820_v60  ;;  %v822_v0 = vpack.c.b16 %v819_v61, %v819_v61  ;;  %v797_v60 = vpack.c.b16 %v794_v55, %v794_v55 }
 0x172   : > { %v807_v57 = vld.sshfl [vmem:[#allocation1 + $0x10] sm:$0xff pattern:$0x73625140]  ;;  %v805_v58 = vld.sshfl [vmem:[#allocation1 + $0x8] sm:$0xff pattern:$0x73625140] }
 0x173   : > { %813 = vrot.lane.b32.xlu1 %v807_v57, %s1442_s29  ;;  %811 = vrot.lane.b32.xlu0 %v805_v58, %s1442_s29  ;;  %v803_v51 = vld.sshfl [vmem:[#allocation1] sm:$0xff pattern:$0x73625140]  ;;  %v799_v57 = vpack.c.b16 %v796_v53, %v796_v53 }
 0x174   : > { %809 = vrot.lane.b32.xlu2 %v803_v51, %s1442_s29  ;;  %v798_v51 = vpack.c.b16 %v795_v54, %v795_v54 }
 0x17b   : > { %829 = vrot.lane.b32.xlu1 %v824_v62, %s1447_s27  ;;  %827 = vrot.lane.b32.xlu0 %v823_v63, %s1447_s27 }
 0x17c   : > { %825 = vrot.lane.b32.xlu2 %v822_v0, %s1447_s27 }
 0x199   : > { %v517_v2 = vpop.permute.xlu2 %516 }
 0x1a1   : > { %v500_v8 = vpop.permute.xlu2 %499 }
 0x1b3   : > { %v504_v1 = vpop.permute.xlu1 %503  ;;  %v502_v3 = vpop.permute.xlu0 %501 }
 0x1b4   : > { %v622_v21 = vpop.permute.xlu2 %621  ;;  %v534_v32 = vsel %vm525_vm8, %v489_v31, %v504_v1  ;;  %v506_v33 = vsel %vm505_vm3, %v500_v8, %v502_v3  ;;  %v507_v34 = vsel %vm505_vm3, %v502_v3, %v504_v1  ;;  %v899_v8 = vld [vmem:[%s1821_s2] sm:$0xff] }
 0x1b5   : > { %v528_v43 = vsel %vm525_vm8, %v487_v37, %v506_v33  ;;  %v531_v44 = vsel %vm525_vm8, %v488_v38, %v507_v34 }
 0x1c9   : > { %v626_v5 = vpop.permute.xlu1 %625 }
 0x1cb   : > { %v624_v7 = vpop.permute.xlu0 %623 }
 0x1cc   : > { %v628_v16 = vsel %vm522_vm7, %v624_v7, %v626_v5  ;;  %v627_v27 = vsel %vm522_vm7, %v622_v21, %v624_v7 }
 0x1ce   : > { %v810_v48 = vpop.permute.xlu2 %809 }
 0x1d1   : > { %v611_v15 = vpop.permute.xlu1 %610 }
 0x1d2   : > { %v637_v17 = vsel %vm525_vm8, %v600_v14, %v611_v15 }
 0x1d3   : > { %v609_v20 = vpop.permute.xlu0 %608  ;;  %v643_v24 = vsel %vm416_vm0, %v637_v17, %v628_v16  ;;  %v1116_v16 = vld [vmem:[%s1823_s4] sm:$0xff] }
 0x1d4   : > { %v612_v26 = vsel %vm505_vm3, %v609_v20, %v611_v15  ;;  %v631_v12 = vsel %vm525_vm8, %v598_v6, %v609_v20  ;;  %653 = vrot.lane.b32.xlu1 %v643_v24, %s1445_s25  ;;  %v1292_v15 = vld [vmem:[%s1820_s1 + $0x4] sm:$0xf] }
 0x1d5   : > { %v639_v28 = vsel %vm416_vm0, %v631_v12, %v622_v21  ;;  %v634_v29 = vsel %vm525_vm8, %v599_v25, %v612_v26  ;;  %v541_v21 = vld [vmem:[%s1820_s1] sm:$0xf]  ;;  %v1448_v26 = vmov 1.0  }
 0x1d6   : > { %649 = vrot.lane.b32.xlu2 %v639_v28, %s1445_s25  ;;  %v641_v22 = vsel %vm416_vm0, %v634_v29, %v627_v27  ;;  %v826_v59 = vpop.permute.xlu2 %825 }
 0x1d7   : > { %651 = vrot.lane.b32.xlu0 %v641_v22, %s1445_s25 }
 0x1d9   : > { %v521_v35 = vpop.permute.xlu1 %520 }
 0x1da   : > { %v540_v36 = vsel %vm416_vm0, %v534_v32, %v521_v35  ;;  %v1297_v32 = vld [vmem:[%s1820_s1 + $0x8] sm:$0xf] }
 0x1db   : > { %v519_v40 = vpop.permute.xlu0 %518 }
 0x1dc   : > { %v523_v41 = vsel %vm522_vm7, %v517_v2, %v519_v40  ;;  %v524_v42 = vsel %vm522_vm7, %v519_v40, %v521_v35  ;;  %702 = vrot.lane.b32.xlu1 %v540_v36, %s1444_s21 }
 0x1dd   : > { %v536_v45 = vsel %vm416_vm0, %v528_v43, %v523_v41  ;;  %v538_v47 = vsel %vm416_vm0, %v531_v44, %v524_v42 }
 0x1de   : > { %698 = vrot.lane.b32.xlu2 %v536_v45, %s1444_s21 }
 0x1df   : > { %700 = vrot.lane.b32.xlu0 %v538_v47, %s1444_s21  ;;  %s1290_s21 = sshll.u32 %s1559_s30, 3  ;;  %s376_s30 = sand.u32 1, %s1430_s14  }
 0x1e0   : > { %s391_s27 = scalar_lea.vmem %s1825_s6, %s1290_s21  ;;  %s387_s12 = scalar_lea.vmem %s1824_s5, %s1290_s21 }
 0x1e1   : > { %v1133_v12 = vld [vmem:[%s391_s27] sm:$0xff]  ;;  %s1287_s21 = sshll.u32 %s376_s30, 3  ;;  %s1184_s29 = scalar_lea.sflag [#allocation4], %s376_s30 }
 0x1e2   : > { %s378_s17 = scalar_lea.vmem [#allocation3], %s1287_s21  ;;  %s1396_s21 = scalar_lea.hbm %s1829_s10, 16 }
 0x1e3   : > { %s1197_s27 = sshll.u32 %s378_s17, 4  ;;  %s1198_s27 = int_to_ptr.vmem [resolvable:$true] %s1197_s27 }
 0x1e5   : > { %v814_v52 = vpop.permute.xlu1 %813  ;;  %v812_v46 = vpop.permute.xlu0 %811 }
 0x1e6   : > { %v816_v56 = vsel %vm505_vm3, %v812_v46, %v814_v52  ;;  %v815_v58 = vsel %vm505_vm3, %v810_v48, %v812_v46  ;;  %v841_v61 = vsel %vm525_vm8, %v799_v57, %v814_v52 }
 0x1e7   : > { %v838_v39 = vsel %vm525_vm8, %v798_v51, %v816_v56  ;;  %v835_v2 = vsel %vm525_vm8, %v797_v60, %v815_v58 }
 0x1ed   : > { %v830_v62 = vpop.permute.xlu1 %829  ;;  %v828_v63 = vpop.permute.xlu0 %827 }
 0x1ee   : > { %v831_v0 = vsel %vm522_vm7, %v826_v59, %v828_v63  ;;  %v832_v1 = vsel %vm522_vm7, %v828_v63, %v830_v62  ;;  %v847_v49 = vsel %vm416_vm0, %v841_v61, %v830_v62  ;;  %v989_v59 = vld [vmem:[%s1828_s9] sm:$0xf] }
 0x1ef   : > { %857 = vrot.lane.b32.xlu1 %v847_v49, %s1446_s26  ;;  %v845_v3 = vsel %vm416_vm0, %v838_v39, %v832_v1  ;;  %v843_v4 = vsel %vm416_vm0, %v835_v2, %v831_v0  ;;  %v1049_v49 = vld [vmem:[%s1827_s8] sm:$0xff] }
 0x1f0   : > { %855 = vrot.lane.b32.xlu0 %v845_v3, %s1446_s26  ;;  %853 = vrot.lane.b32.xlu2 %v843_v4, %s1446_s26  ;;  %s1195_s26 = scalar_lea.hbm %s1829_s10, %s1314_s18 }
 0x1f1   : > { %s1199_s28 = sshll.u32 %s1195_s26, 4  ;;  %s1200_s28 = int_to_ptr.hbm [resolvable:$true] %s1199_s28 }
 0x1f2   : > { %s1390_s11 = sshra.s32 %s1200_s28, 4  ;;  %s1391_s11 = int_to_ptr.hbm [resolvable:$true] %s1390_s11 }
 0x1f3   : > { %p1397_p0 = scmp.lt.s32.totalorder %s1391_s11, %s1829_s10 }
 0x1f8   : > { %902 = vperm.xlu2 %1363, %v899_v8  }
 0x200   : > { %1119 = vperm.xlu2 %1363, %v1116_v16  }
 0x208   : > { %1136 = vperm.xlu2 %1363, %v1133_v12  }
 0x230   : > { %v650_v7 = vpop.permute.xlu2 %649 }
 0x238   : > { %v699_v6 = vpop.permute.xlu2 %698 }
 0x246   : > { %v654_v5 = vpop.permute.xlu1 %653 }
 0x249   : > { %v652_v9 = vpop.permute.xlu0 %651 }
 0x24a   : > { %v656_v10 = vsel %vm574_vm4, %v650_v7, %v652_v9  ;;  %v657_v11 = vsel %vm574_vm4, %v652_v9, %v654_v5  ;;  %v854_v28 = vpop.permute.xlu2 %853 }
 0x24b   : > { %v664_v13 = vsel %vm662_vm9, %v656_v10, 0  ;;  %v667_v14 = vsel %vm662_vm9, %v657_v11, 0 }
 0x24c   : > { %676 = vmatpush.bf16.msra.mxu0 %v664_v13  ;;  %689 = vmatpush.bf16.msra.mxu1 %v667_v14 }
 0x24e   : > { %v703_v17 = vpop.permute.xlu1 %702 }
 0x24f   : > { %1293 = vmatmul.msk.bf16.vlgmr.msra.gmra.mxu0 %vm658_vm10, %v1292_v15  ;;  %1294 = vmatmul.msk.bf16.vlgmr.msra.gmra.mxu1 %vm658_vm10, %v1292_v15  ;;  %v1107_v15 = vld [vmem:[%s1822_s3] sm:$0xff] }
 0x251   : > { %v701_v18 = vpop.permute.xlu0 %700 }
 0x252   : > { %v705_v19 = vsel %vm704_vm6, %v699_v6, %v701_v18  ;;  %v706_v20 = vsel %vm704_vm6, %v701_v18, %v703_v17  ;;  %v903_v50 = vpop.permute.xlu2 %902  ;;  %v1124_v6 = vld [vmem:[%s387_s12] sm:$0xff]  ;;  %s1392_s12 = scalar_lea.hbm %s1391_s11, 8 }
 0x253   : > { %v711_v24 = vsel %vm662_vm9, %v705_v19, 0  ;;  %v714_v25 = vsel %vm662_vm9, %v706_v20, 0  ;;  %v1125_v18 = vadd.f32 1.0, %v1124_v6  ;;  %p1393_p11 = scmp.ne.s32.totalorder %s1391_s11, %s1392_s12  ;;  %p1398_p1 = scmp.lt.s32.totalorder %s1396_s21, %s1392_s12 }
 0x254   : > { %723 = vmatpush.bf16.msra.mxu2 %v711_v24  ;;  %736 = vmatpush.bf16.msra.mxu3 %v714_v25 }
 0x255   : > { %p1394_p12 = pnand %p1393_p11, %p1542_p5  ;;  %p1399_p2 = por %p1398_p1, %p1397_p0 }
 0x257   : > { %1295 = vmatmul.msk.bf16.vlgmr.msra.gmra.mxu2 %vm658_vm10, %v541_v21  ;;  %1296 = vmatmul.msk.bf16.vlgmr.msra.gmra.mxu3 %vm658_vm10, %v541_v21  ;;  %p1395_p13 = pneg %p1394_p12 }
 0x258   : > { %907 = vmatpush.msrb.mxu2 %v1448_v26  ;;  %927 = vmatpush.msrb.mxu3 %v1448_v26 }
 0x259   : > { %p1400_p3 = pnand %p1399_p2, %p1395_p13 }
 0x25a   : > { %908 = vmatpush.msrb.mxu2 %v1448_v26  ;;  %928 = vmatpush.msrb.mxu3 %v1448_v26  ;;  %v1120_v20 = vpop.permute.xlu2 %1119 }
 0x25c   : > { %909 = vmatpush.msrb.mxu2 %v1448_v26  ;;  %929 = vmatpush.msrb.mxu3 %v1448_v26 }
 0x25e   : > { %910 = vmatpush.msrb.mxu2 %v1448_v26  ;;  %930 = vmatpush.msrb.mxu3 %v1448_v26 }
 0x260   : > { %911 = vmatpush.msrb.mxu2 %v1448_v26  ;;  %931 = vmatpush.msrb.mxu3 %v1448_v26 }
 0x261   : > { %v858_v27 = vpop.permute.xlu1 %857 }
 0x262   : > { %912 = vmatpush.msrb.mxu2 %v1448_v26  ;;  %932 = vmatpush.msrb.mxu3 %v1448_v26  ;;  %v856_v29 = vpop.permute.xlu0 %855 }
 0x263   : > { %v860_v22 = vsel %vm463_vm2, %v854_v28, %v856_v29  ;;  %v861_v23 = vsel %vm463_vm2, %v856_v29, %v858_v27 }
 0x264   : > { %913 = vmatpush.msrb.mxu2 %v1448_v26  ;;  %933 = vmatpush.msrb.mxu3 %v1448_v26  ;;  %v866_v30 = vsel %vm662_vm9, %v860_v22, 0  ;;  %v869_v31 = vsel %vm662_vm9, %v861_v23, 0 }
 0x265   : > { %878 = vmatpush.bf16.msrb.mxu0 %v866_v30  ;;  %891 = vmatpush.bf16.msrb.mxu1 %v869_v31  ;;  %v1137_v30 = vpop.permute.xlu2 %1136 }
 0x266   : > { %914 = vmatpush.msrb.mxu2 %v1448_v26  ;;  %934 = vmatpush.msrb.mxu3 %v1448_v26 }
 0x268   : > { %915 = vmatpush.msrb.mxu2 %v1448_v26  ;;  %935 = vmatpush.msrb.mxu3 %v1448_v26 }
 0x269   : > { %949 = vmatpush.msra.mxu0 %v1448_v26  ;;  %969 = vmatpush.msra.mxu1 %v1448_v26 }
 0x26a   : > { %1298 = vmatmul.msk.bf16.vlgmr.msrb.gmra.mxu0 %vm658_vm10, %v1297_v32  ;;  %1299 = vmatmul.msk.bf16.vlgmr.msrb.gmra.mxu1 %vm658_vm10, %v1297_v32 }
 0x26b   : > { %950 = vmatpush.msra.mxu0 %v1448_v26  ;;  %970 = vmatpush.msra.mxu1 %v1448_v26 }
 0x26c   : > { %916 = vmatpush.msrb.mxu2 %v1448_v26  ;;  %936 = vmatpush.msrb.mxu3 %v1448_v26 }
 0x26d   : > { %951 = vmatpush.msra.mxu0 %v1448_v26  ;;  %971 = vmatpush.msra.mxu1 %v1448_v26 }
 0x26e   : > { %917 = vmatpush.msrb.mxu2 %v1448_v26  ;;  %937 = vmatpush.msrb.mxu3 %v1448_v26 }
 0x26f   : > { %952 = vmatpush.msra.mxu0 %v1448_v26  ;;  %972 = vmatpush.msra.mxu1 %v1448_v26 }
 0x270   : > { %918 = vmatpush.msrb.mxu2 %v1448_v26  ;;  %938 = vmatpush.msrb.mxu3 %v1448_v26 }
 0x271   : > { %953 = vmatpush.msra.mxu0 %v1448_v26  ;;  %973 = vmatpush.msra.mxu1 %v1448_v26 }
 0x272   : > { %919 = vmatpush.msrb.mxu2 %v1448_v26  ;;  %939 = vmatpush.msrb.mxu3 %v1448_v26 }
 0x273   : > { %954 = vmatpush.msra.mxu0 %v1448_v26  ;;  %974 = vmatpush.msra.mxu1 %v1448_v26 }
 0x274   : > { %920 = vmatpush.msrb.mxu2 %v1448_v26  ;;  %940 = vmatpush.msrb.mxu3 %v1448_v26 }
 0x275   : > { %955 = vmatpush.msra.mxu0 %v1448_v26  ;;  %975 = vmatpush.msra.mxu1 %v1448_v26 }
 0x276   : > { %921 = vmatpush.msrb.mxu2 %v1448_v26  ;;  %941 = vmatpush.msrb.mxu3 %v1448_v26 }
 0x277   : > { %956 = vmatpush.msra.mxu0 %v1448_v26  ;;  %976 = vmatpush.msra.mxu1 %v1448_v26 }
 0x278   : > { %922 = vmatpush.msrb.mxu2 %v1448_v26  ;;  %942 = vmatpush.msrb.mxu3 %v1448_v26 }
 0x279   : > { %957 = vmatpush.msra.mxu0 %v1448_v26  ;;  %977 = vmatpush.msra.mxu1 %v1448_v26 }
 0x27b   : > { %958 = vmatpush.msra.mxu0 %v1448_v26  ;;  %978 = vmatpush.msra.mxu1 %v1448_v26 }
 0x27d   : > { %959 = vmatpush.msra.mxu0 %v1448_v26  ;;  %979 = vmatpush.msra.mxu1 %v1448_v26 }
 0x27f   : > { %960 = vmatpush.msra.mxu0 %v1448_v26  ;;  %980 = vmatpush.msra.mxu1 %v1448_v26 }
 0x281   : > { %961 = vmatpush.msra.mxu0 %v1448_v26  ;;  %981 = vmatpush.msra.mxu1 %v1448_v26 }
 0x283   : > { %962 = vmatpush.msra.mxu0 %v1448_v26  ;;  %982 = vmatpush.msra.mxu1 %v1448_v26 }
 0x285   : > { %963 = vmatpush.msra.mxu0 %v1448_v26  ;;  %983 = vmatpush.msra.mxu1 %v1448_v26 }
 0x287   : > { %964 = vmatpush.msra.mxu0 %v1448_v26  ;;  %984 = vmatpush.msra.mxu1 %v1448_v26 }
 0x2cc   : > { %v678_v33 = vpop.f32.mrf.mxu0  ;;  %v691_v34 = vpop.f32.mrf.mxu1 }
 0x2d4   : > { %v680_v35 = vpop.f32.mrf.mxu0  ;;  %v693_v36 = vpop.f32.mrf.mxu1 }
 0x2da   : > { %v725_v37 = vpop.f32.mrf.mxu2  ;;  %v738_v38 = vpop.f32.mrf.mxu3 }
 0x2db   : > { %v726_v42 = vadd.f32 %v725_v37, %v678_v33  ;;  %v739_v43 = vadd.f32 %v738_v38, %v691_v34 }
 0x2e2   : > { %v727_v40 = vpop.f32.mrf.mxu2  ;;  %v740_v41 = vpop.f32.mrf.mxu3 }
 0x2e7   : > { %v880_v44 = vpop.f32.mrf.mxu0  ;;  %v893_v45 = vpop.f32.mrf.mxu1 }
 0x2e8   : > { %v897_v47 = vadd.f32 %v880_v44, %v726_v42  ;;  %v898_v48 = vadd.f32 %v893_v45, %v739_v43 }
 0x2ea   : > { %v905_v52 = vadd.f32 %v903_v50, %v897_v47  ;;  %v906_v46 = vadd.f32 %v903_v50, %v898_v48 }
 0x2ec   : > { %v947_v53 = vmul.f32 %v905_v52, %v905_v52  ;;  %v948_v54 = vmul.f32 %v906_v46, %v906_v46  ;;  %923 = vmatmul.f32.vlgmr.msrb.gmra.mxu2 %v905_v52  ;;  %943 = vmatmul.f32.vlgmr.msrb.gmra.mxu3 %v906_v46 }
 0x2ee   : > { %965 = vmatmul.f32.vlgmr.msra.gmra.mxu0 %v947_v53  ;;  %985 = vmatmul.f32.vlgmr.msra.gmra.mxu1 %v948_v54 }
 0x2ef   : > { %v882_v55 = vpop.f32.mrf.mxu0  ;;  %v895_v56 = vpop.f32.mrf.mxu1 }
 0x36b   : > { %v966_v57 = vpop.f32.mrf.mxu0  ;;  %v986_v58 = vpop.f32.mrf.mxu1 }
 0x36c   : > { %v987_v51 = vadd.f32 %v986_v58, %v966_v57 }
 0x36e   : > { %1030 = vmatpush.msra.mxu3 %v987_v51 }
 0x36f   : > { %v924_v60 = vpop.f32.mrf.mxu2  ;;  %v944_v61 = vpop.f32.mrf.mxu3  ;;  %1301 = vmatmul.msk.f32.vlgmr.msra.gmra.mxu3 %vm990_vm11, %v989_v59 }
 0x370   : > { %v945_v62 = vadd.f32 %v944_v61, %v924_v60 }
 0x372   : > { %1009 = vmatpush.msra.mxu2 %v945_v62 }
 0x373   : > { %1300 = vmatmul.msk.f32.vlgmr.msra.gmra.mxu2 %vm990_vm11, %v989_v59 }
 0x3f2   : > { %v1032_v63 = vpop.f32.mrf.mxu3 }
 0x3f3   : > { %v1035_v1 = vmul.f32 0.001953125, %v1032_v63 }
 0x3f6   : > { %v1011_v39 = vpop.f32.mrf.mxu2 }
 0x3f7   : > { %v1014_v0 = vmul.f32 0.001953125, %v1011_v39 }
 0x3f9   : > { %v1036_v2 = vmul.f32 %v1014_v0, %v1014_v0  ;;  %1302 = vmatpush.msk.msrb.mxu2 %vm416_vm0, %v1014_v0 }
 0x3fa   : > { %1303 = vmatmul.msk.f32.vlgmr.msrb.gmra.mxu2 %vm1050_vm12, %v1049_v49 }
 0x3fb   : > { %v1037_v3 = vsub.f32 %v1035_v1, %v1036_v2 }
 0x3fd   : > { %v1038_v4 = vadd.f32 1e-05, %v1037_v3 }
 0x3ff   : > { %1366 = vrsqrt.f32 %v1038_v4  ;;  %vm1045_vm14 = vweird.f32 %v1038_v4 }
 0x405   : > { %v1367_v5 = vpop.eup %1366 }
 0x406   : > { %v1040_v7 = vmul.f32 %v1367_v5, %v1038_v4  ;;  %vm1046_vm13 = vweird.f32 %v1367_v5 }
 0x407   : > { %vm1047_vm15 = vmor %vm1045_vm14, %vm1046_vm13 }
 0x408   : > { %v1041_v8 = vmul.f32 %v1367_v5, %v1040_v7 }
 0x40a   : > { %v1042_v9 = vmul.f32 0.5, %v1041_v8 }
 0x40c   : > { %v1043_v10 = vsub.f32 1.5, %v1042_v9 }
 0x40e   : > { %v1044_v11 = vmul.f32 %v1367_v5, %v1043_v10 }
 0x410   : > { %v1048_v13 = vsel %vm1047_vm15, %v1367_v5, %v1044_v11 }
 0x411   : > { %1304 = vmatpush.msk.msrb.mxu3 %vm416_vm0, %v1048_v13 }
 0x412   : > { %1305 = vmatmul.msk.f32.vlgmr.msrb.gmra.mxu3 %vm1050_vm12, %v1049_v49 }
 0x47d   : > { %v1074_v14 = vpop.f32.mrf.mxu2 }
 0x47e   : > { %1102 = vperm.xlu0 %1364, %v1074_v14  }
 0x495   : > { %v1097_v16 = vpop.f32.mrf.mxu3 }
 0x496   : > { %v1108_v17 = vmul.f32 %v1107_v15, %v1097_v16 }
 0x498   : > { %1111 = vperm.xlu1 %1365, %v1108_v17  }
 0x4a0   : > { %1128 = vperm.xlu1 %1365, %v1125_v18  }
 0x4f0   : > { %v1103_v19 = vpop.permute.xlu0 %1102 }
 0x4f1   : > { %v1105_v25 = vsub.f32 %v905_v52, %v1103_v19  ;;  %v1106_v21 = vsub.f32 %v906_v46, %v1103_v19 }
 0x50a   : > { %v1112_v24 = vpop.permute.xlu1 %1111 }
 0x50b   : > { %v1114_v26 = vmul.f32 %v1112_v24, %v1105_v25  ;;  %v1115_v12 = vmul.f32 %v1112_v24, %v1106_v21 }
 0x50d   : > { %v1122_v27 = vadd.f32 %v1120_v20, %v1114_v26  ;;  %v1123_v28 = vadd.f32 %v1120_v20, %v1115_v12 }
 0x512   : > { %v1129_v29 = vpop.permute.xlu1 %1128 }
 0x513   : > { %v1131_v22 = vmul.f32 %v1129_v29, %v1122_v27  ;;  %v1132_v23 = vmul.f32 %v1129_v29, %v1123_v28 }
 0x515   : > { %v1139_v31 = vadd.f32 %v1137_v30, %v1131_v22  ;;  %v1140_v32 = vadd.f32 %v1137_v30, %v1132_v23 }
 0x517   : > { %v1306_v33 = vmul.f32 -1.442695, %v1139_v31  ;;  %v1307_v34 = vmul.f32 -1.442695, %v1140_v32 }
 0x519   : > { %1368 = vpow2.f32 %v1306_v33 }
 0x51a   : > { %1370 = vpow2.f32 %v1307_v34 }
 0x51f   : > { %v1369_v35 = vpop.eup %1368 }
 0x520   : > { %v1371_v36 = vpop.eup %1370  ;;  %v1147_v37 = vadd.f32 1.0, %v1369_v35 }
 0x521   : > { %v1148_v38 = vadd.f32 1.0, %v1371_v36 }
 0x522   : > { %1372 = vrcp.f32 %v1147_v37  ;;  %v1160_v45 = vand.u32 2147483648, %v1147_v37  ;;  %v1158_v50 = vand.u32 2147483647, %v1147_v37  ;;  %vm1154_vm2 = vweird.f32 %v1147_v37 }
 0x523   : > { %1374 = vrcp.f32 %v1148_v38  ;;  %v1175_v52 = vand.u32 2147483648, %v1148_v38  ;;  %v1173_v53 = vand.u32 2147483647, %v1148_v38  ;;  %vm1169_vm4 = vweird.f32 %v1148_v38 }
 0x524   : > { %v1161_v55 = vor.u32 1.1754944e-38, %v1160_v45  ;;  %vm1159_vm5 = vcmp.eq.f32.partialorder %v1158_v50, 8.507059e+37 }
 0x525   : > { %v1176_v58 = vor.u32 1.1754944e-38, %v1175_v52  ;;  %vm1174_vm7 = vcmp.eq.f32.partialorder %v1173_v53, 8.507059e+37 }
 0x528   : > { %v1373_v40 = vpop.eup %1372 }
 0x529   : > { %v1375_v41 = vpop.eup %1374  ;;  %v1150_v42 = vmul.f32 %v1373_v40, %v1147_v37  ;;  %vm1155_vm0 = vweird.f32 %v1373_v40 }
 0x52a   : > { %v1165_v43 = vmul.f32 %v1375_v41, %v1148_v38  ;;  %vm1170_vm1 = vweird.f32 %v1375_v41  ;;  %vm1156_vm3 = vmor %vm1154_vm2, %vm1155_vm0 }
 0x52b   : > { %v1151_v44 = vsub.f32 1.0, %v1150_v42  ;;  %vm1171_vm6 = vmor %vm1169_vm4, %vm1170_vm1 }
 0x52c   : > { %v1166_v47 = vsub.f32 1.0, %v1165_v43 }
 0x52d   : > { %v1152_v48 = vmul.f32 %v1373_v40, %v1151_v44 }
 0x52e   : > { %v1167_v46 = vmul.f32 %v1375_v41, %v1166_v47 }
 0x52f   : > { %v1153_v54 = vadd.f32 %v1373_v40, %v1152_v48 }
 0x530   : > { %v1168_v56 = vadd.f32 %v1375_v41, %v1167_v46 }
 0x531   : > { %v1157_v57 = vsel %vm1156_vm3, %v1373_v40, %v1153_v54 }
 0x532   : > { %v1162_v51 = vsel %vm1159_vm5, %v1161_v55, %v1157_v57  ;;  %v1172_v59 = vsel %vm1171_vm6, %v1375_v41, %v1168_v56 }
 0x533   : > { %v1177_v60 = vsel %vm1174_vm7, %v1176_v58, %v1172_v59  ;;  %v1179_v61 = vmul.f32 %v1162_v51, %v1139_v31 }
 0x534   : > { %v1180_v62 = vmul.f32 %v1177_v60, %v1140_v32 }
 0x536   : > { %v1181_v63 = vpack.c.bf16 %v1180_v62, %v1179_v61 }
 0x538   : > { %1182 = vst [vmem:[%s378_s17] sm:$0xff] %v1181_v63 }
 0x539   : > { %1403 = shalt.err (!%p1400_p3)
}
 0x53a   : > { %1315 = dma.vmem_to_hbm [thread:$0]  (%p1542_p5), %s1198_s27, 128, %s1200_s28, %s1184_s29  }
 0x53b PF: > { %p1321_p4 = scmp.ge.s32.totalorder %s1438_s16, 2  ;;  %s1211_s30 = sand.u32 1, %s1426_s13  }
 0x53c   : > { %s1212_s17 = scalar_lea.sflag [#allocation4], %s1211_s30 }
 0x53d   : > { %p1318_p7 = pnand %p1321_p4, %p1546_p6 }
 0x53f   : > { %p1319_p8 = pneg %p1318_p7 }
 0x541   : > { %1421 = dma.done.wait (%p1319_p8), %s1212_s17, 128  }
 0x542   : > { %1423 = vsyncadd (%p1319_p8), %s1212_s17, 4294967168  ;;  %p20_p9 = scmp.ge.s32.totalorder %s1529_s19, 4   ;;  %s1832_s13 = smov %s1430_s14 }
 0x543   : > { %s1833_s14 = smov %s1434_s15  ;;  %s1834_s15 = smov %s1540_s22 }
 0x544   : > { %s1835_s16 = smov %s1529_s19  ;;  %22 = sbr.rel (!%p20_p9) target bundleno = 3 (0x3), region = 112 }
 0x549   :  { %1218 = vsyncpa [#allocation4], 1 }
 0x54a   :  { %1220 = vsyncpa [#allocation4 + $0x1], 1 }

</bundles_post_ra>
